<compile_context>
chip_gen: v5e
topology: v5e:2x2
jax: 0.10.0
libtpu: 0.0.40
codegen_flags: <defaults>
</compile_context>

<pallas_src>
import jax
import jax.numpy as jnp
from jax.experimental import pallas as pl
from jax.experimental.pallas import tpu as pltpu

K_IN = 784         # flattened 1x28x28 input, un-padded (784 == full array dim)
N_OUT = 10
N_PAD = 128        # logits padded to a full lane width (lane-dense stores)
NEG_BIAS = -1e30   # bias for pad logit columns -> exp() == 0 in the softmax
MAX_TILE_B = 2048  # rows per grid step (f32 input tile = 6.1 MiB, dbl-buffered)


def _round_up(x, m):
    return ((x + m - 1) // m) * m


def mlp_kernel(x_ref, w1_ref, b1_ref, w2_ref, b2_ref,
               w3_ref, b3_ref, w4_ref, b4_ref, out_ref):
    """One (tile_b, 784) batch tile: fused 4-layer MLP + log_softmax.

    Matmuls run bf16 on the MXU with f32 accumulation; elementwise math in f32.
    """
    # Cast the activations to bf16 on the VMEM tile (no wrapper-side HBM pass).
    x = x_ref[...].astype(jnp.bfloat16)                             # (tb, 784)

    # fc1 + ReLU
    h = jnp.dot(x, w1_ref[...], preferred_element_type=jnp.float32)
    h = jnp.maximum(h + b1_ref[...], 0.0)                           # (tb, 256) f32
    # dropout(p=0.2) -> identity in eval mode

    # fc2 + ReLU
    h = jnp.dot(h.astype(jnp.bfloat16), w2_ref[...],
                preferred_element_type=jnp.float32)
    h = jnp.maximum(h + b2_ref[...], 0.0)                           # (tb, 256)
    # dropout(p=0.2) -> identity in eval mode

    # fc3 + ReLU
    h = jnp.dot(h.astype(jnp.bfloat16), w3_ref[...],
                preferred_element_type=jnp.float32)
    h = jnp.maximum(h + b3_ref[...], 0.0)                           # (tb, 128)

    # fc4 (logits padded to 128 lanes; pad columns carry a -1e30 bias)
    logits = jnp.dot(h.astype(jnp.bfloat16), w4_ref[...],
                     preferred_element_type=jnp.float32)
    logits = logits + b4_ref[...]                                   # (tb, 128)

    # log_softmax over the lane axis (pad columns contribute exp(-1e30) == 0)
    m = jnp.max(logits, axis=-1, keepdims=True)
    shifted = logits - m
    lse = jnp.log(jnp.sum(jnp.exp(shifted), axis=-1, keepdims=True))
    out_ref[...] = (shifted - lse).astype(out_ref.dtype)            # bf16 store


def prepare_params(params):
    """One-time param prep (outside the per-forward path):
    transpose PyTorch (out,in) -> (in,out), cast weights to bf16, pad fc4's
    N dim 10->128, and set the padded fc4 bias columns to -1e30 so the
    in-kernel softmax ignores them. No K padding (784 is kept as-is)."""
    (w1, b1), (w2, b2), (w3, b3), (w4, b4) = params

    w1t = w1.T.astype(jnp.bfloat16)                                  # (784, 256)
    w2t = w2.T.astype(jnp.bfloat16)                                  # (256, 256)
    w3t = w3.T.astype(jnp.bfloat16)                                  # (256, 128)
    w4t = jnp.zeros((128, N_PAD), jnp.bfloat16).at[:, :N_OUT].set(
        w4.T.astype(jnp.bfloat16))                                   # (128, 128)

    b1r = b1.reshape(1, -1).astype(jnp.float32)
    b2r = b2.reshape(1, -1).astype(jnp.float32)
    b3r = b3.reshape(1, -1).astype(jnp.float32)
    b4r = jnp.full((1, N_PAD), NEG_BIAS, jnp.float32).at[0, :N_OUT].set(
        b4.astype(jnp.float32))

    return (w1t, b1r, w2t, b2r, w3t, b3r, w4t, b4r)


def mlp_forward(x_nchw, prepped):
    """Flatten NCHW input and run the batch-tiled fused kernel.

    Wrapper-side HBM work is minimal: a free reshape, an optional pad of the
    batch to a multiple of 16, and the final tiny [:B, :10] slice."""
    B = x_nchw.shape[0]
    x = x_nchw.reshape(B, -1)                     # (B, 784), metadata-only
    assert x.shape[1] == K_IN

    b_pad = _round_up(B, 16)
    if b_pad != B:                                # only pad to a multiple of 16
        x = jnp.pad(x, ((0, b_pad - B), (0, 0)))

    # tile_b ~= ceil(B/2) (multiple of 16, capped): >=2 parallel blocks for
    # large B (both v7x TensorCores busy) while amortizing per-step overhead.
    tile_b = max(16, min(MAX_TILE_B, _round_up(pl.cdiv(b_pad, 2), 16)))
    n_blocks = pl.cdiv(b_pad, tile_b)             # partial last block is masked

    w1t, b1r, w2t, b2r, w3t, b3r, w4t, b4r = prepped

    def const_spec(a):
        # Same block every grid step -> fetched once, kept VMEM-resident.
        return pl.BlockSpec(a.shape, lambda i, nd=a.ndim: (0,) * nd)

    out_padded = pl.pallas_call(
        mlp_kernel,
        out_shape=jax.ShapeDtypeStruct((b_pad, N_PAD), jnp.bfloat16),
        grid=(n_blocks,),
        in_specs=[pl.BlockSpec((tile_b, K_IN), lambda i: (i, 0)),
                  const_spec(w1t), const_spec(b1r),
                  const_spec(w2t), const_spec(b2r),
                  const_spec(w3t), const_spec(b3r),
                  const_spec(w4t), const_spec(b4r)],
        out_specs=pl.BlockSpec((tile_b, N_PAD), lambda i: (i, 0)),
        compiler_params=pltpu.CompilerParams(
            dimension_semantics=("parallel",),
            vmem_limit_bytes=48 * 1024 * 1024),
    )(x, w1t, b1r, w2t, b2r, w3t, b3r, w4t, b4r)

    return out_padded[:B, :N_OUT]                 # bf16 (B, 10)


def init_params(key):
    """Deterministic init mimicking PyTorch nn.Linear default (uniform +/-1/sqrt(fan_in))."""
    sizes = [(784, 256), (256, 256), (256, 128), (128, 10)]
    params = []
    for (fan_in, fan_out) in sizes:
        key, kw, kb = jax.random.split(key, 3)
        bound = 1.0 / (fan_in ** 0.5)
        w = jax.random.uniform(kw, (fan_out, fan_in), jnp.float32,
                               minval=-bound, maxval=bound)
        b = jax.random.uniform(kb, (fan_out,), jnp.float32,
                               minval=-bound, maxval=bound)
        params.append((w, b))
    return params


def reference_forward(x_nchw, params):
    """Pure-JAX f32 reference (eval-mode dropout)."""
    B = x_nchw.shape[0]
    h = x_nchw.reshape(B, -1).astype(jnp.float32)
    (w1, b1), (w2, b2), (w3, b3), (w4, b4) = params
    h = jnp.maximum(h @ w1.T + b1, 0.0)
    h = jnp.maximum(h @ w2.T + b2, 0.0)
    h = jnp.maximum(h @ w3.T + b3, 0.0)
    logits = h @ w4.T + b4
    return jax.nn.log_softmax(logits, axis=-1)


if __name__ == "__main__":
    key = jax.random.PRNGKey(0)
    key, kx = jax.random.split(key)

    # MNIST-like input: (batch=2, channels=1, 28, 28) -> flattened to 784.
    x = jax.random.normal(kx, (2, 1, 28, 28), dtype=jnp.float32)
    params = init_params(key)
    prepped = prepare_params(params)   # one-time: transpose + bf16 cast + N-pad

    fwd = jax.jit(mlp_forward)
    out = fwd(x, prepped)
    out = jax.block_until_ready(out)

    assert out.shape == (2, 10)
    out_f32 = out.astype(jnp.float32)
    # log_softmax rows should exp-sum to 1 (bf16 output rounding -> loose atol).
    assert jnp.allclose(jnp.exp(out_f32).sum(axis=1), 1.0, atol=2e-2)
    # Match the f32 reference within bf16 tolerance.
    ref = reference_forward(x, params)
    assert jnp.allclose(out_f32, ref, atol=1e-1), float(jnp.abs(out_f32 - ref).max())
    print("KERNEL_OK")
</pallas_src>

<mosaic_0001>
module attributes {stable_mosaic.version = 11 : i64} {
  func.func @mlp_kernel(%arg0: i32, %arg1: memref<16x784xf32, #tpu.memory_space<vmem>>, %arg2: memref<784x256xbf16, #tpu.memory_space<vmem>>, %arg3: memref<1x256xf32, #tpu.memory_space<vmem>>, %arg4: memref<256x256xbf16, #tpu.memory_space<vmem>>, %arg5: memref<1x256xf32, #tpu.memory_space<vmem>>, %arg6: memref<256x128xbf16, #tpu.memory_space<vmem>>, %arg7: memref<1x128xf32, #tpu.memory_space<vmem>>, %arg8: memref<128x128xbf16, #tpu.memory_space<vmem>>, %arg9: memref<1x128xf32, #tpu.memory_space<vmem>>, %arg10: memref<16x128xbf16, #tpu.memory_space<vmem>>) attributes {dimension_semantics = [#tpu.dimension_semantics<parallel>], iteration_bounds = array<i64: 1>, scalar_prefetch = 0 : i64, scratch_operands = 0 : i64, tpu.core_type = #tpu.core_type<tc>, window_params = [{transform_indices = @transform_0, window_bounds = array<i64: 16, 784>}, {pipeline_mode = #tpu.pipeline_mode<synchronous>, transform_indices = @transform_1, window_bounds = array<i64: 784, 256>}, {pipeline_mode = #tpu.pipeline_mode<synchronous>, transform_indices = @transform_2, window_bounds = array<i64: 1, 256>}, {pipeline_mode = #tpu.pipeline_mode<synchronous>, transform_indices = @transform_3, window_bounds = array<i64: 256, 256>}, {pipeline_mode = #tpu.pipeline_mode<synchronous>, transform_indices = @transform_4, window_bounds = array<i64: 1, 256>}, {pipeline_mode = #tpu.pipeline_mode<synchronous>, transform_indices = @transform_5, window_bounds = array<i64: 256, 128>}, {pipeline_mode = #tpu.pipeline_mode<synchronous>, transform_indices = @transform_6, window_bounds = array<i64: 1, 128>}, {pipeline_mode = #tpu.pipeline_mode<synchronous>, transform_indices = @transform_7, window_bounds = array<i64: 128, 128>}, {pipeline_mode = #tpu.pipeline_mode<synchronous>, transform_indices = @transform_8, window_bounds = array<i64: 1, 128>}, {transform_indices = @transform_9, window_bounds = array<i64: 16, 128>}]} {
    %c0 = arith.constant 0 : index
    %c0_0 = arith.constant 0 : index
    %0 = vector.load %arg1[%c0, %c0_0] : memref<16x784xf32, #tpu.memory_space<vmem>>, vector<16x784xf32>
    %1 = arith.truncf %0 : vector<16x784xf32> to vector<16x784xbf16>
    %c0_1 = arith.constant 0 : index
    %c0_2 = arith.constant 0 : index
    %2 = vector.load %arg2[%c0_1, %c0_2] : memref<784x256xbf16, #tpu.memory_space<vmem>>, vector<784x256xbf16>
    %cst = arith.constant dense<0.000000e+00> : vector<16x256xf32>
    %3 = tpu.matmul %1, %2, %cst {dimension_numbers = #tpu.dot_dimension_numbers<[1], [0], [0], [1], [0, 0, 1, 1], [], []>} : vector<16x784xbf16>, vector<784x256xbf16>, vector<16x256xf32> -> vector<16x256xf32>
    %c0_3 = arith.constant 0 : index
    %c0_4 = arith.constant 0 : index
    %4 = vector.load %arg3[%c0_3, %c0_4] : memref<1x256xf32, #tpu.memory_space<vmem>>, vector<1x256xf32>
    %5 = vector.broadcast %4 : vector<1x256xf32> to vector<16x256xf32>
    %6 = arith.addf %3, %5 : vector<16x256xf32>
    %cst_5 = arith.constant 0.000000e+00 : f32
    %7 = vector.broadcast %cst_5 : f32 to vector<16x256xf32>
    %8 = arith.maximumf %6, %7 : vector<16x256xf32>
    %9 = arith.truncf %8 : vector<16x256xf32> to vector<16x256xbf16>
    %c0_6 = arith.constant 0 : index
    %c0_7 = arith.constant 0 : index
    %10 = vector.load %arg4[%c0_6, %c0_7] : memref<256x256xbf16, #tpu.memory_space<vmem>>, vector<256x256xbf16>
    %cst_8 = arith.constant dense<0.000000e+00> : vector<16x256xf32>
    %11 = tpu.matmul %9, %10, %cst_8 {dimension_numbers = #tpu.dot_dimension_numbers<[1], [0], [0], [1], [0, 0, 1, 1], [], []>} : vector<16x256xbf16>, vector<256x256xbf16>, vector<16x256xf32> -> vector<16x256xf32>
    %c0_9 = arith.constant 0 : index
    %c0_10 = arith.constant 0 : index
    %12 = vector.load %arg5[%c0_9, %c0_10] : memref<1x256xf32, #tpu.memory_space<vmem>>, vector<1x256xf32>
    %13 = vector.broadcast %12 : vector<1x256xf32> to vector<16x256xf32>
    %14 = arith.addf %11, %13 : vector<16x256xf32>
    %cst_11 = arith.constant 0.000000e+00 : f32
    %15 = vector.broadcast %cst_11 : f32 to vector<16x256xf32>
    %16 = arith.maximumf %14, %15 : vector<16x256xf32>
    %17 = arith.truncf %16 : vector<16x256xf32> to vector<16x256xbf16>
    %c0_12 = arith.constant 0 : index
    %c0_13 = arith.constant 0 : index
    %18 = vector.load %arg6[%c0_12, %c0_13] : memref<256x128xbf16, #tpu.memory_space<vmem>>, vector<256x128xbf16>
    %cst_14 = arith.constant dense<0.000000e+00> : vector<16x128xf32>
    %19 = tpu.matmul %17, %18, %cst_14 {dimension_numbers = #tpu.dot_dimension_numbers<[1], [0], [0], [1], [0, 0, 1, 1], [], []>} : vector<16x256xbf16>, vector<256x128xbf16>, vector<16x128xf32> -> vector<16x128xf32>
    %c0_15 = arith.constant 0 : index
    %c0_16 = arith.constant 0 : index
    %20 = vector.load %arg7[%c0_15, %c0_16] : memref<1x128xf32, #tpu.memory_space<vmem>>, vector<1x128xf32>
    %21 = vector.broadcast %20 : vector<1x128xf32> to vector<16x128xf32>
    %22 = arith.addf %19, %21 : vector<16x128xf32>
    %cst_17 = arith.constant 0.000000e+00 : f32
    %23 = vector.broadcast %cst_17 : f32 to vector<16x128xf32>
    %24 = arith.maximumf %22, %23 : vector<16x128xf32>
    %25 = arith.truncf %24 : vector<16x128xf32> to vector<16x128xbf16>
    %c0_18 = arith.constant 0 : index
    %c0_19 = arith.constant 0 : index
    %26 = vector.load %arg8[%c0_18, %c0_19] : memref<128x128xbf16, #tpu.memory_space<vmem>>, vector<128x128xbf16>
    %cst_20 = arith.constant dense<0.000000e+00> : vector<16x128xf32>
    %27 = tpu.matmul %25, %26, %cst_20 {dimension_numbers = #tpu.dot_dimension_numbers<[1], [0], [0], [1], [0, 0, 1, 1], [], []>} : vector<16x128xbf16>, vector<128x128xbf16>, vector<16x128xf32> -> vector<16x128xf32>
    %c0_21 = arith.constant 0 : index
    %c0_22 = arith.constant 0 : index
    %28 = vector.load %arg9[%c0_21, %c0_22] : memref<1x128xf32, #tpu.memory_space<vmem>>, vector<1x128xf32>
    %29 = vector.broadcast %28 : vector<1x128xf32> to vector<16x128xf32>
    %30 = arith.addf %27, %29 : vector<16x128xf32>
    %cst_23 = arith.constant dense<0xFF800000> : vector<16xf32>
    %31 = vector.multi_reduction <maximumf>, %30, %cst_23 [1] : vector<16x128xf32> to vector<16xf32>
    %32 = vector.shape_cast %31 : vector<16xf32> to vector<16x1xf32>
    %33 = vector.broadcast %32 : vector<16x1xf32> to vector<16x128xf32>
    %34 = arith.subf %30, %33 : vector<16x128xf32>
    %35 = math.exp %34 : vector<16x128xf32>
    %cst_24 = arith.constant dense<0.000000e+00> : vector<16xf32>
    %36 = vector.multi_reduction <add>, %35, %cst_24 [1] : vector<16x128xf32> to vector<16xf32>
    %37 = vector.shape_cast %36 : vector<16xf32> to vector<16x1xf32>
    %38 = math.log %37 : vector<16x1xf32>
    %39 = vector.broadcast %38 : vector<16x1xf32> to vector<16x128xf32>
    %40 = arith.subf %34, %39 : vector<16x128xf32>
    %41 = arith.truncf %40 : vector<16x128xf32> to vector<16x128xbf16>
    %c0_25 = arith.constant 0 : index
    %c0_26 = arith.constant 0 : index
    %42 = vector.load %arg10[%c0_25, %c0_26] : memref<16x128xbf16, #tpu.memory_space<vmem>>, vector<16x128xbf16>
    tpu.vector_store %arg10[%c0_25, %c0_26], %41 {strides = array<i32>} : memref<16x128xbf16, #tpu.memory_space<vmem>>, vector<16x128xbf16>,
    return
  }
  func.func @transform_0(%arg0: i32) -> (i32, i32) {
    %c0_i32 = arith.constant 0 : i32
    %c0_i32_0 = arith.constant 0 : i32
    return %arg0, %c0_i32 : i32, i32
  }
  func.func @transform_1(%arg0: i32) -> (i32, i32) {
    %c0_i32 = arith.constant 0 : i32
    %c0_i32_0 = arith.constant 0 : i32
    %c0_i32_1 = arith.constant 0 : i32
    return %c0_i32, %c0_i32_0 : i32, i32
  }
  func.func @transform_2(%arg0: i32) -> (i32, i32) {
    %c0_i32 = arith.constant 0 : i32
    %c0_i32_0 = arith.constant 0 : i32
    %c0_i32_1 = arith.constant 0 : i32
    return %c0_i32, %c0_i32_0 : i32, i32
  }
  func.func @transform_3(%arg0: i32) -> (i32, i32) {
    %c0_i32 = arith.constant 0 : i32
    %c0_i32_0 = arith.constant 0 : i32
    %c0_i32_1 = arith.constant 0 : i32
    return %c0_i32, %c0_i32_0 : i32, i32
  }
  func.func @transform_4(%arg0: i32) -> (i32, i32) {
    %c0_i32 = arith.constant 0 : i32
    %c0_i32_0 = arith.constant 0 : i32
    %c0_i32_1 = arith.constant 0 : i32
    return %c0_i32, %c0_i32_0 : i32, i32
  }
  func.func @transform_5(%arg0: i32) -> (i32, i32) {
    %c0_i32 = arith.constant 0 : i32
    %c0_i32_0 = arith.constant 0 : i32
    %c0_i32_1 = arith.constant 0 : i32
    return %c0_i32, %c0_i32_0 : i32, i32
  }
  func.func @transform_6(%arg0: i32) -> (i32, i32) {
    %c0_i32 = arith.constant 0 : i32
    %c0_i32_0 = arith.constant 0 : i32
    %c0_i32_1 = arith.constant 0 : i32
    return %c0_i32, %c0_i32_0 : i32, i32
  }
  func.func @transform_7(%arg0: i32) -> (i32, i32) {
    %c0_i32 = arith.constant 0 : i32
    %c0_i32_0 = arith.constant 0 : i32
    %c0_i32_1 = arith.constant 0 : i32
    return %c0_i32, %c0_i32_0 : i32, i32
  }
  func.func @transform_8(%arg0: i32) -> (i32, i32) {
    %c0_i32 = arith.constant 0 : i32
    %c0_i32_0 = arith.constant 0 : i32
    %c0_i32_1 = arith.constant 0 : i32
    return %c0_i32, %c0_i32_0 : i32, i32
  }
  func.func @transform_9(%arg0: i32) -> (i32, i32) {
    %c0_i32 = arith.constant 0 : i32
    %c0_i32_0 = arith.constant 0 : i32
    return %arg0, %c0_i32 : i32, i32
  }
}

</mosaic_0001>

<bundles_post_ra>
// kernel: mlp_forward.1
= control target key start
LH: loop header
LB: loop body
LE: loop exit
PB: predicated region body
PF: predicated region fallthrough
CT: control target
= control target key end

     0   :  { %14 = vsyncpa [#allocation3], 0  ;;  %s2635_s0 = inlined_call_operand.vmem [shape: f32[16,784], index: 0, kind: input, shape index: {}]   ;;  %s2636_s1 = inlined_call_operand.hbm [shape: bf16[784,256], index: 1, kind: input, shape index: {}]   ;;  %s2637_s2 = inlined_call_operand.vmem [shape: f32[1,256], index: 2, kind: input, shape index: {}]   ;;  %s2638_s3 = inlined_call_operand.vmem [shape: bf16[256,256], index: 3, kind: input, shape index: {}]   ;;  %s2639_s4 = inlined_call_operand.vmem [shape: f32[1,256], index: 4, kind: input, shape index: {}]   ;;  %s2640_s5 = inlined_call_operand.hbm [shape: bf16[256,128], index: 5, kind: input, shape index: {}]   ;;  %s2641_s6 = inlined_call_operand.vmem [shape: f32[1,128], index: 6, kind: input, shape index: {}]   ;;  %s2642_s7 = inlined_call_operand.vmem [shape: bf16[128,128], index: 7, kind: input, shape index: {}]   ;;  %s2643_s8 = inlined_call_operand.vmem [shape: f32[1,128], index: 8, kind: input, shape index: {}]   ;;  %s2644_s9 = inlined_call_operand.vmem [shape: bf16[16,128], index: 9, kind: output, shape index: {}]  }
   0x1   :  { %s22_s11 = sshll.u32 %s2636_s1, 4  ;;  %s23_s11 = int_to_ptr.hbm [resolvable:$true] %s22_s11 }
   0x2   :  { %15 = vsyncpa [#allocation5], 0  ;;  %s2266_s12 = smov [#allocation2]   ;;  %s41_s16 = sshll.u32 %s2640_s5, 4  ;;  %s42_s16 = int_to_ptr.hbm [resolvable:$true] %s41_s16 }
   0x3   :  { %s24_s13 = sshll.u32 %s2266_s12, 4  ;;  %s2267_s17 = smov 128   ;;  %s25_s13 = int_to_ptr.vmem [resolvable:$true] %s24_s13 }
   0x4   :  { %s2268_s18 = smov 8   ;;  %s2269_s19 = smov [#allocation4]  }
   0x5   :  { %30 = dma.hbm_to_vmem [thread:$0]  %s23_s11, 12544, %s25_s13, [#allocation3], %s2267_s17, %s2267_s17, %s2268_s18  }
   0x6   :  { %s43_s20 = sshll.u32 %s2269_s19, 4  ;;  %s2270_s21 = smov 64   ;;  %s44_s20 = int_to_ptr.vmem [resolvable:$true] %s43_s20 }
   0x7   :  { %s2271_s22 = smov 4  }
   0x8   :  { %49 = dma.hbm_to_vmem [thread:$0]  %s42_s16, 2048, %s44_s20, [#allocation5], %s2270_s21, %s2270_s21, %s2271_s22  }
   0x9   :  { %2262 = dma.done.wait [#allocation3], 12544  }
   0xa   :  { %2263 = vsyncadd [#allocation3], 4294954752 }
   0xb   :  { %2264 = dma.done.wait [#allocation5], 2048  }
   0xc   :  { %2265 = vsyncadd [#allocation5], 4294965248  ;;  %v1479_v0 = vld [vmem:[#allocation2 + $0x70] sm:$0xf]  ;;  %v2054_v1 = vld [vmem:[#allocation2 + $0x74] sm:$0xf0] }
   0xd   :  { %v1607_v2 = vld [vmem:[#allocation2 + $0x170] sm:$0xf]  ;;  %v1480_v3 = vor.u32 %v2054_v1, %v1479_v0  ;;  %v2086_v4 = vld [vmem:[#allocation2 + $0x174] sm:$0xf0]  ;;  %v1471_v11 = vld [vmem:[#allocation2 + $0x60] sm:$0xf] }
   0xe   :  { %v1671_v5 = vld [vmem:[#allocation2 + $0x1f0] sm:$0xf]  ;;  %v2102_v6 = vld [vmem:[#allocation2 + $0x1f4] sm:$0xf0]  ;;  %v1608_v7 = vor.u32 %v2086_v4, %v1607_v2  ;;  %v2052_v13 = vld [vmem:[#allocation2 + $0x64] sm:$0xf0] }
   0xf   :  { %v1672_v8 = vor.u32 %v2102_v6, %v1671_v5  ;;  %v1543_v9 = vld [vmem:[#allocation2 + $0xf0] sm:$0xf]  ;;  %v2070_v10 = vld [vmem:[#allocation2 + $0xf4] sm:$0xf0]  ;;  %684 = vmatpush.bf16.msra.mxu0 %v1480_v3  ;;  %v1599_v14 = vld [vmem:[#allocation2 + $0x160] sm:$0xf]  ;;  %v1472_v16 = vor.u32 %v2052_v13, %v1471_v11 }
  0x10   :  { %v1544_v12 = vor.u32 %v2070_v10, %v1543_v9  ;;  %v2084_v15 = vld [vmem:[#allocation2 + $0x164] sm:$0xf0]  ;;  %712 = vmatpush.bf16.msra.mxu2 %v1608_v7  ;;  %v1663_v18 = vld [vmem:[#allocation2 + $0x1e0] sm:$0xf]  ;;  %v1463_v23 = vld [vmem:[#allocation2 + $0x50] sm:$0xf] }
  0x11   :  { %726 = vmatpush.bf16.msra.mxu3 %v1672_v8  ;;  %v1600_v17 = vor.u32 %v2084_v15, %v1599_v14  ;;  %v2100_v19 = vld [vmem:[#allocation2 + $0x1e4] sm:$0xf0]  ;;  %v1535_v20 = vld [vmem:[#allocation2 + $0xe0] sm:$0xf]  ;;  %v2050_v24 = vld [vmem:[#allocation2 + $0x54] sm:$0xf0] }
  0x12   :  { %698 = vmatpush.bf16.msra.mxu1 %v1544_v12  ;;  %v1664_v21 = vor.u32 %v2100_v19, %v1663_v18  ;;  %v2068_v22 = vld [vmem:[#allocation2 + $0xe4] sm:$0xf0]  ;;  %v1591_v26 = vld [vmem:[#allocation2 + $0x150] sm:$0xf]  ;;  %v2082_v27 = vld [vmem:[#allocation2 + $0x154] sm:$0xf0]  ;;  %v1464_v29 = vor.u32 %v2050_v24, %v1463_v23 }
  0x13   :  { %v1536_v25 = vor.u32 %v2068_v22, %v1535_v20  ;;  %v1655_v28 = vld [vmem:[#allocation2 + $0x1d0] sm:$0xf]  ;;  %685 = vmatpush.bf16.msra.mxu0 %v1472_v16  ;;  %v2098_v30 = vld [vmem:[#allocation2 + $0x1d4] sm:$0xf0]  ;;  %v1592_v33 = vor.u32 %v2082_v27, %v1591_v26  ;;  %v1455_v35 = vld [vmem:[#allocation2 + $0x40] sm:$0xf] }
  0x14   :  { %v1527_v31 = vld [vmem:[#allocation2 + $0xd0] sm:$0xf]  ;;  %v2066_v32 = vld [vmem:[#allocation2 + $0xd4] sm:$0xf0]  ;;  %713 = vmatpush.bf16.msra.mxu2 %v1600_v17  ;;  %v1656_v34 = vor.u32 %v2098_v30, %v1655_v28  ;;  %v2048_v36 = vld [vmem:[#allocation2 + $0x44] sm:$0xf0] }
  0x15   :  { %727 = vmatpush.bf16.msra.mxu3 %v1664_v21  ;;  %v1583_v37 = vld [vmem:[#allocation2 + $0x140] sm:$0xf]  ;;  %v1528_v38 = vor.u32 %v2066_v32, %v1527_v31  ;;  %v2080_v39 = vld [vmem:[#allocation2 + $0x144] sm:$0xf0]  ;;  %v1456_v44 = vor.u32 %v2048_v36, %v1455_v35  ;;  %v1447_v47 = vld [vmem:[#allocation2 + $0x30] sm:$0xf] }
  0x16   :  { %699 = vmatpush.bf16.msra.mxu1 %v1536_v25  ;;  %v1647_v40 = vld [vmem:[#allocation2 + $0x1c0] sm:$0xf]  ;;  %v2096_v41 = vld [vmem:[#allocation2 + $0x1c4] sm:$0xf0]  ;;  %v1584_v45 = vor.u32 %v2080_v39, %v1583_v37  ;;  %v2046_v48 = vld [vmem:[#allocation2 + $0x34] sm:$0xf0] }
  0x17   :  { %v1519_v42 = vld [vmem:[#allocation2 + $0xc0] sm:$0xf]  ;;  %v2064_v43 = vld [vmem:[#allocation2 + $0xc4] sm:$0xf0]  ;;  %686 = vmatpush.bf16.msra.mxu0 %v1464_v29  ;;  %v1648_v46 = vor.u32 %v2096_v41, %v1647_v40  ;;  %v1575_v49 = vld [vmem:[#allocation2 + $0x130] sm:$0xf]  ;;  %v1448_v56 = vor.u32 %v2046_v48, %v1447_v47 }
  0x18   :  { %714 = vmatpush.bf16.msra.mxu2 %v1592_v33  ;;  %v1520_v50 = vor.u32 %v2064_v43, %v1519_v42  ;;  %v2078_v51 = vld [vmem:[#allocation2 + $0x134] sm:$0xf0]  ;;  %v1639_v52 = vld [vmem:[#allocation2 + $0x1b0] sm:$0xf]  ;;  %v1439_v59 = vld [vmem:[#allocation2 + $0x20] sm:$0xf] }
  0x19   :  { %728 = vmatpush.bf16.msra.mxu3 %v1656_v34  ;;  %v2094_v53 = vld [vmem:[#allocation2 + $0x1b4] sm:$0xf0]  ;;  %v1511_v54 = vld [vmem:[#allocation2 + $0xb0] sm:$0xf]  ;;  %v1576_v57 = vor.u32 %v2078_v51, %v1575_v49  ;;  %v2044_v60 = vld [vmem:[#allocation2 + $0x24] sm:$0xf0] }
  0x1a   :  { %700 = vmatpush.bf16.msra.mxu1 %v1528_v38  ;;  %v2062_v55 = vld [vmem:[#allocation2 + $0xb4] sm:$0xf0]  ;;  %v1640_v58 = vor.u32 %v2094_v53, %v1639_v52  ;;  %v1567_v61 = vld [vmem:[#allocation2 + $0x120] sm:$0xf]  ;;  %v2076_v63 = vld [vmem:[#allocation2 + $0x124] sm:$0xf0]  ;;  %v1440_v4 = vor.u32 %v2044_v60, %v1439_v59 }
  0x1b   :  { %687 = vmatpush.bf16.msra.mxu0 %v1456_v44  ;;  %v1512_v62 = vor.u32 %v2062_v55, %v1511_v54  ;;  %v1631_v0 = vld [vmem:[#allocation2 + $0x1a0] sm:$0xf]  ;;  %v2092_v1 = vld [vmem:[#allocation2 + $0x1a4] sm:$0xf0]  ;;  %v1431_v5 = vld [vmem:[#allocation2 + $0x10] sm:$0xf]  ;;  %v1568_v6 = vor.u32 %v2076_v63, %v1567_v61 }
  0x1c   :  { %715 = vmatpush.bf16.msra.mxu2 %v1584_v45  ;;  %v1503_v2 = vld [vmem:[#allocation2 + $0xa0] sm:$0xf]  ;;  %v2060_v3 = vld [vmem:[#allocation2 + $0xa4] sm:$0xf0]  ;;  %v1632_v7 = vor.u32 %v2092_v1, %v1631_v0  ;;  %v2042_v8 = vld [vmem:[#allocation2 + $0x14] sm:$0xf0] }
  0x1d   :  { %729 = vmatpush.bf16.msra.mxu3 %v1648_v46  ;;  %v1559_v9 = vld [vmem:[#allocation2 + $0x110] sm:$0xf]  ;;  %v2074_v10 = vld [vmem:[#allocation2 + $0x114] sm:$0xf0]  ;;  %v1504_v11 = vor.u32 %v2060_v3, %v1503_v2  ;;  %v1423_v16 = vld [vmem:[#allocation2] sm:$0xf]  ;;  %v1432_v18 = vor.u32 %v2042_v8, %v1431_v5 }
  0x1e   :  { %701 = vmatpush.bf16.msra.mxu1 %v1520_v50  ;;  %v1623_v12 = vld [vmem:[#allocation2 + $0x190] sm:$0xf]  ;;  %v2090_v13 = vld [vmem:[#allocation2 + $0x194] sm:$0xf0]  ;;  %v2040_v17 = vld [vmem:[#allocation2 + $0x4] sm:$0xf0]  ;;  %v1560_v23 = vor.u32 %v2074_v10, %v1559_v9 }
  0x1f   :  { %688 = vmatpush.bf16.msra.mxu0 %v1448_v56  ;;  %v1495_v14 = vld [vmem:[#allocation2 + $0x90] sm:$0xf]  ;;  %v2058_v15 = vld [vmem:[#allocation2 + $0x94] sm:$0xf0]  ;;  %v1551_v19 = vld [vmem:[#allocation2 + $0x100] sm:$0xf]  ;;  %v1624_v24 = vor.u32 %v2090_v13, %v1623_v12  ;;  %v1424_v35 = vor.u32 %v2040_v17, %v1423_v16 }
  0x20   :  { %716 = vmatpush.bf16.msra.mxu2 %v1576_v57  ;;  %v2072_v20 = vld [vmem:[#allocation2 + $0x104] sm:$0xf0]  ;;  %v1615_v21 = vld [vmem:[#allocation2 + $0x180] sm:$0xf]  ;;  %v1735_v25 = vld [vmem:[#allocation2 + $0x270] sm:$0xf]  ;;  %v1496_v28 = vor.u32 %v2058_v15, %v1495_v14 }
  0x21   :  { %730 = vmatpush.bf16.msra.mxu3 %v1640_v58  ;;  %v2088_v22 = vld [vmem:[#allocation2 + $0x184] sm:$0xf0]  ;;  %v2118_v26 = vld [vmem:[#allocation2 + $0x274] sm:$0xf0]  ;;  %v2053_v27 = vld [vmem:[#allocation2 + $0x74] sm:$0xf]  ;;  %v1552_v39 = vor.u32 %v2072_v20, %v1551_v19 }
  0x22   :  { %702 = vmatpush.bf16.msra.mxu1 %v1512_v62  ;;  %v1481_v29 = vld [vmem:[#allocation2 + $0x78] sm:$0xf0]  ;;  %v1487_v30 = vld [vmem:[#allocation2 + $0x80] sm:$0xf]  ;;  %v2056_v31 = vld [vmem:[#allocation2 + $0x84] sm:$0xf0]  ;;  %v1616_v40 = vor.u32 %v2088_v22, %v1615_v21  ;;  %v1736_v44 = vor.u32 %v2118_v26, %v1735_v25 }
  0x23   :  { %689 = vmatpush.bf16.msra.mxu0 %v1440_v4  ;;  %v67_v32 = vld [vmem:[%s2635_s0 + $0x10] sm:$0xff]  ;;  %v74_v33 = vld [vmem:[%s2635_s0 + $0x48] sm:$0xff]  ;;  %v2134_v36 = vld [vmem:[#allocation2 + $0x2f4] sm:$0xf0]  ;;  %v1484_v45 = vor.u32 %v2053_v27, %v1481_v29  ;;  %v1488_v49 = vor.u32 %v2056_v31, %v1487_v30  ;;  %vm680_vm0 = vcmask 130048  }
  0x24   :  { %717 = vmatpush.bf16.msra.mxu2 %v1568_v6  ;;  %v1799_v34 = vld [vmem:[#allocation2 + $0x2f0] sm:$0xf]  ;;  %v1807_v37 = vld [vmem:[#allocation2 + $0x300] sm:$0xf]  ;;  %v2136_v38 = vld [vmem:[#allocation2 + $0x304] sm:$0xf0]  ;;  %v2346_v54 = vpack.c.bf16 %v74_v33, %v67_v32 }
  0x25   :  { %731 = vmatpush.bf16.msra.mxu3 %v1632_v7  ;;  %v2069_v41 = vld [vmem:[#allocation2 + $0xf4] sm:$0xf]  ;;  %v1545_v42 = vld [vmem:[#allocation2 + $0xf8] sm:$0xf0]  ;;  %v65_v43 = vld [vmem:[%s2635_s0] sm:$0xff]  ;;  %v1808_v50 = vor.u32 %v2136_v38, %v1807_v37  ;;  %v1800_v55 = vor.u32 %v2134_v36, %v1799_v34 }
  0x26   :  { %703 = vmatpush.bf16.msra.mxu1 %v1504_v11  ;;  %v72_v46 = vld [vmem:[%s2635_s0 + $0x38] sm:$0xff]  ;;  %v75_v48 = vld [vmem:[%s2635_s0 + $0x50] sm:$0xff]  ;;  %v1727_v51 = vld [vmem:[#allocation2 + $0x260] sm:$0xf]  ;;  %v1548_v59 = vor.u32 %v2069_v41, %v1545_v42 }
  0x27   :  { %690 = vmatpush.bf16.msra.mxu0 %v1432_v18  ;;  %v68_v47 = vld [vmem:[%s2635_s0 + $0x18] sm:$0xff]  ;;  %v2116_v52 = vld [vmem:[#allocation2 + $0x264] sm:$0xf0]  ;;  %v2051_v53 = vld [vmem:[#allocation2 + $0x64] sm:$0xf]  ;;  %v2354_v60 = vpack.c.bf16 %v72_v46, %v65_v43 }
  0x28   :  { %718 = vmatpush.bf16.msra.mxu2 %v1560_v23  ;;  %v1473_v56 = vld [vmem:[#allocation2 + $0x68] sm:$0xf0]  ;;  %v73_v58 = vld [vmem:[%s2635_s0 + $0x40] sm:$0xff]  ;;  %v2132_v62 = vld [vmem:[#allocation2 + $0x2e4] sm:$0xf0]  ;;  %v2356_v63 = vpack.c.bf16 %v75_v48, %v68_v47  ;;  %v1728_v0 = vor.u32 %v2116_v52, %v1727_v51 }
  0x29   :  { %732 = vmatpush.bf16.msra.mxu3 %v1624_v24  ;;  %v66_v57 = vld [vmem:[%s2635_s0 + $0x8] sm:$0xff]  ;;  %v1791_v61 = vld [vmem:[#allocation2 + $0x2e0] sm:$0xf]  ;;  %v2067_v1 = vld [vmem:[#allocation2 + $0xe4] sm:$0xf]  ;;  %v1476_v3 = vor.u32 %v2051_v53, %v1473_v56 }
  0x2a   :  { %704 = vmatpush.bf16.msra.mxu1 %v1496_v28  ;;  %v1537_v2 = vld [vmem:[#allocation2 + $0xe8] sm:$0xf0]  ;;  %v2358_v4 = vpack.c.bf16 %v73_v58, %v66_v57  ;;  %v1719_v5 = vld [vmem:[#allocation2 + $0x250] sm:$0xf]  ;;  %v2114_v6 = vld [vmem:[#allocation2 + $0x254] sm:$0xf0]  ;;  %v1792_v7 = vor.u32 %v2132_v62, %v1791_v61 }
  0x2b   :  { %691 = vmatpush.bf16.msra.mxu0 %v1424_v35  ;;  %v2049_v8 = vld [vmem:[#allocation2 + $0x54] sm:$0xf]  ;;  %v1465_v9 = vld [vmem:[#allocation2 + $0x58] sm:$0xf0]  ;;  %v1540_v10 = vor.u32 %v2067_v1, %v1537_v2  ;;  %v1783_v11 = vld [vmem:[#allocation2 + $0x2d0] sm:$0xf]  ;;  %v1720_v13 = vor.u32 %v2114_v6, %v1719_v5 }
  0x2c   :  { %719 = vmatpush.bf16.msra.mxu2 %v1552_v39  ;;  %v2130_v12 = vld [vmem:[#allocation2 + $0x2d4] sm:$0xf0]  ;;  %v2065_v14 = vld [vmem:[#allocation2 + $0xd4] sm:$0xf]  ;;  %v1529_v15 = vld [vmem:[#allocation2 + $0xd8] sm:$0xf0]  ;;  %v1468_v16 = vor.u32 %v2049_v8, %v1465_v9 }
  0x2d   :  { %733 = vmatpush.bf16.msra.mxu3 %v1616_v40  ;;  %v1711_v17 = vld [vmem:[#allocation2 + $0x240] sm:$0xf]  ;;  %v2112_v18 = vld [vmem:[#allocation2 + $0x244] sm:$0xf0]  ;;  %v1784_v19 = vor.u32 %v2130_v12, %v1783_v11  ;;  %v2047_v20 = vld [vmem:[#allocation2 + $0x44] sm:$0xf]  ;;  %v1532_v22 = vor.u32 %v2065_v14, %v1529_v15 }
  0x2e   :  { %705 = vmatpush.bf16.msra.mxu1 %v1488_v49  ;;  %692 = vmatmul.bf16.vlgmr.msra.gmra.mxu0 %v2354_v60  ;;  %v1457_v21 = vld [vmem:[#allocation2 + $0x48] sm:$0xf0]  ;;  %v1775_v23 = vld [vmem:[#allocation2 + $0x2c0] sm:$0xf]  ;;  %v2128_v24 = vld [vmem:[#allocation2 + $0x2c4] sm:$0xf0]  ;;  %v1712_v25 = vor.u32 %v2112_v18, %v1711_v17 }
  0x2f   :  { %740 = vmatpush.bf16.msrb.mxu0 %v1736_v44  ;;  %720 = vmatmul.bf16.vlgmr.msra.gmra.mxu2 %v2346_v54  ;;  %v2063_v26 = vld [vmem:[#allocation2 + $0xc4] sm:$0xf]  ;;  %v1521_v27 = vld [vmem:[#allocation2 + $0xc8] sm:$0xf0]  ;;  %v1460_v28 = vor.u32 %v2047_v20, %v1457_v21  ;;  %v1703_v29 = vld [vmem:[#allocation2 + $0x230] sm:$0xf]  ;;  %v1776_v31 = vor.u32 %v2128_v24, %v1775_v23 }
  0x30   :  { %775 = vmatpush.bf16.msrb.mxu2 %v1808_v50  ;;  %734 = vmatmul.bf16.vlgmr.msra.gmra.mxu3 %v2356_v63  ;;  %v2110_v30 = vld [vmem:[#allocation2 + $0x234] sm:$0xf0]  ;;  %v2045_v32 = vld [vmem:[#allocation2 + $0x34] sm:$0xf]  ;;  %v1449_v33 = vld [vmem:[#allocation2 + $0x38] sm:$0xf0]  ;;  %v1524_v35 = vor.u32 %v2063_v26, %v1521_v27 }
  0x31   :  { %782 = vmatpush.bf16.msrb.mxu3 %v1484_v45  ;;  %706 = vmatmul.bf16.vlgmr.msra.gmra.mxu1 %v2358_v4  ;;  %v1767_v34 = vld [vmem:[#allocation2 + $0x2b0] sm:$0xf]  ;;  %v2126_v36 = vld [vmem:[#allocation2 + $0x2b4] sm:$0xf0]  ;;  %v78_v38 = vld [vmem:[%s2635_s0 + $0x68] sm:$0xff]  ;;  %v1704_v39 = vor.u32 %v2110_v30, %v1703_v29  ;;  %v1452_v42 = vor.u32 %v2045_v32, %v1449_v33 }
  0x32   :  { %754 = vmatpush.bf16.msrb.mxu1 %v1800_v55  ;;  %v71_v37 = vld [vmem:[%s2635_s0 + $0x30] sm:$0xff]  ;;  %v1513_v41 = vld [vmem:[#allocation2 + $0xb8] sm:$0xf0]  ;;  %v1695_v43 = vld [vmem:[#allocation2 + $0x220] sm:$0xf]  ;;  %v1768_v45 = vor.u32 %v2126_v36, %v1767_v34 }
  0x33   :  { %741 = vmatpush.bf16.msrb.mxu0 %v1728_v0  ;;  %v2061_v40 = vld [vmem:[#allocation2 + $0xb4] sm:$0xf]  ;;  %v2108_v44 = vld [vmem:[#allocation2 + $0x224] sm:$0xf0]  ;;  %v2043_v46 = vld [vmem:[#allocation2 + $0x24] sm:$0xf]  ;;  %v2370_v48 = vpack.c.bf16 %v78_v38, %v71_v37 }
  0x34   :  { %796 = vmatpush.bf16.msra.mxu2 %v1548_v59  ;;  %v1441_v47 = vld [vmem:[#allocation2 + $0x28] sm:$0xf0]  ;;  %v1516_v49 = vor.u32 %v2061_v40, %v1513_v41  ;;  %v1759_v50 = vld [vmem:[#allocation2 + $0x2a0] sm:$0xf]  ;;  %v2124_v51 = vld [vmem:[#allocation2 + $0x2a4] sm:$0xf0]  ;;  %v1696_v52 = vor.u32 %v2108_v44, %v1695_v43 }
  0x35   :  { %783 = vmatpush.bf16.msrb.mxu3 %v1476_v3  ;;  %v2059_v53 = vld [vmem:[#allocation2 + $0xa4] sm:$0xf]  ;;  %v1505_v55 = vld [vmem:[#allocation2 + $0xa8] sm:$0xf0]  ;;  %v1444_v56 = vor.u32 %v2043_v46, %v1441_v47  ;;  %v1687_v57 = vld [vmem:[#allocation2 + $0x210] sm:$0xf]  ;;  %v1760_v61 = vor.u32 %v2124_v51, %v1759_v50 }
  0x36   :  { %755 = vmatpush.bf16.msrb.mxu1 %v1792_v7  ;;  %v2106_v58 = vld [vmem:[#allocation2 + $0x214] sm:$0xf0]  ;;  %v2041_v59 = vld [vmem:[#allocation2 + $0x14] sm:$0xf]  ;;  %v1433_v62 = vld [vmem:[#allocation2 + $0x18] sm:$0xf0]  ;;  %v1508_v2 = vor.u32 %v2059_v53, %v1505_v55 }
  0x37   :  { %742 = vmatpush.bf16.msrb.mxu0 %v1720_v13  ;;  %v1751_v0 = vld [vmem:[#allocation2 + $0x290] sm:$0xf]  ;;  %v2122_v1 = vld [vmem:[#allocation2 + $0x294] sm:$0xf0]  ;;  %v2057_v3 = vld [vmem:[#allocation2 + $0x94] sm:$0xf]  ;;  %v1688_v7 = vor.u32 %v2106_v58, %v1687_v57  ;;  %v1436_v11 = vor.u32 %v2041_v59, %v1433_v62 }
  0x38   :  { %797 = vmatpush.bf16.msra.mxu2 %v1540_v10  ;;  %v1497_v5 = vld [vmem:[#allocation2 + $0x98] sm:$0xf0]  ;;  %v1679_v6 = vld [vmem:[#allocation2 + $0x200] sm:$0xf]  ;;  %v2104_v8 = vld [vmem:[#allocation2 + $0x204] sm:$0xf0]  ;;  %v1752_v15 = vor.u32 %v2122_v1, %v1751_v0 }
  0x39   :  { %784 = vmatpush.bf16.msrb.mxu3 %v1468_v16  ;;  %v2039_v9 = vld [vmem:[#allocation2 + $0x4] sm:$0xf]  ;;  %v1425_v10 = vld [vmem:[#allocation2 + $0x8] sm:$0xf0]  ;;  %v2085_v12 = vld [vmem:[#allocation2 + $0x174] sm:$0xf]  ;;  %v1680_v23 = vor.u32 %v2104_v8, %v1679_v6 }
  0x3a   :  { %756 = vmatpush.bf16.msrb.mxu1 %v1784_v19  ;;  %v1609_v13 = vld [vmem:[#allocation2 + $0x178] sm:$0xf0]  ;;  %v2117_v14 = vld [vmem:[#allocation2 + $0x274] sm:$0xf]  ;;  %v1743_v17 = vld [vmem:[#allocation2 + $0x280] sm:$0xf]  ;;  %v1500_v19 = vor.u32 %v2057_v3, %v1497_v5  ;;  %v1428_v27 = vor.u32 %v2039_v9, %v1425_v10 }
  0x3b   :  { %743 = vmatpush.bf16.msrb.mxu0 %v1712_v25  ;;  %v1737_v16 = vld [vmem:[#allocation2 + $0x278] sm:$0xf0]  ;;  %v2120_v18 = vld [vmem:[#allocation2 + $0x284] sm:$0xf0]  ;;  %v69_v20 = vld [vmem:[%s2635_s0 + $0x20] sm:$0xff] }
  0x3c   :  { %798 = vmatpush.bf16.msra.mxu2 %v1532_v22  ;;  %v76_v21 = vld [vmem:[%s2635_s0 + $0x58] sm:$0xff]  ;;  %v2055_v22 = vld [vmem:[#allocation2 + $0x84] sm:$0xf]  ;;  %v1489_v24 = vld [vmem:[#allocation2 + $0x88] sm:$0xf0]  ;;  %v1740_v32 = vor.u32 %v2117_v14, %v1737_v16  ;;  %v1744_v33 = vor.u32 %v2120_v18, %v1743_v17 }
  0x3d   :  { %785 = vmatpush.bf16.msrb.mxu3 %v1460_v28  ;;  %v2101_v25 = vld [vmem:[#allocation2 + $0x1f4] sm:$0xf]  ;;  %v1673_v26 = vld [vmem:[#allocation2 + $0x1f8] sm:$0xf0]  ;;  %v1612_v28 = vor.u32 %v2085_v12, %v1609_v13  ;;  %v77_v34 = vld [vmem:[%s2635_s0 + $0x60] sm:$0xff]  ;;  %v2386_v37 = vpack.c.bf16 %v76_v21, %v69_v20  ;;  %v1492_v38 = vor.u32 %v2055_v22, %v1489_v24 }
  0x3e   :  { %757 = vmatpush.bf16.msrb.mxu1 %v1776_v31  ;;  %v2133_v29 = vld [vmem:[#allocation2 + $0x2f4] sm:$0xf]  ;;  %v1801_v30 = vld [vmem:[#allocation2 + $0x2f8] sm:$0xf0]  ;;  %v70_v31 = vld [vmem:[%s2635_s0 + $0x28] sm:$0xff]  ;;  %v1676_v41 = vor.u32 %v2101_v25, %v1673_v26 }
  0x3f   :  { %744 = vmatpush.bf16.msrb.mxu0 %v1704_v39  ;;  %1813 = vmatmul.msk.bf16.vlgmr.msrb.gmra.mxu2 %vm680_vm0, %v2370_v48  ;;  %v1601_v36 = vld [vmem:[#allocation2 + $0x168] sm:$0xf0]  ;;  %v2115_v39 = vld [vmem:[#allocation2 + $0x264] sm:$0xf]  ;;  %v2388_v44 = vpack.c.bf16 %v77_v34, %v70_v31  ;;  %v2081_v51 = vld [vmem:[#allocation2 + $0x154] sm:$0xf] }
  0x40   :  { %799 = vmatpush.bf16.msra.mxu2 %v1524_v35  ;;  %v2083_v35 = vld [vmem:[#allocation2 + $0x164] sm:$0xf]  ;;  %v1729_v40 = vld [vmem:[#allocation2 + $0x268] sm:$0xf0]  ;;  %v2113_v53 = vld [vmem:[#allocation2 + $0x254] sm:$0xf] }
  0x41   :  { %786 = vmatpush.bf16.msrb.mxu3 %v1452_v42  ;;  %v1804_v42 = vor.u32 %v2133_v29, %v1801_v30  ;;  %v2099_v43 = vld [vmem:[#allocation2 + $0x1e4] sm:$0xf]  ;;  %v1665_v46 = vld [vmem:[#allocation2 + $0x1e8] sm:$0xf0]  ;;  %v1732_v50 = vor.u32 %v2115_v39, %v1729_v40  ;;  %v1721_v55 = vld [vmem:[#allocation2 + $0x258] sm:$0xf0] }
  0x42   :  { %758 = vmatpush.bf16.msrb.mxu1 %v1768_v45  ;;  %v1604_v45 = vor.u32 %v2083_v35, %v1601_v36  ;;  %v2131_v47 = vld [vmem:[#allocation2 + $0x2e4] sm:$0xf]  ;;  %v2097_v58 = vld [vmem:[#allocation2 + $0x1d4] sm:$0xf]  ;;  %v1785_v0 = vld [vmem:[#allocation2 + $0x2d8] sm:$0xf0]  ;;  %v1724_v1 = vor.u32 %v2113_v53, %v1721_v55 }
  0x43   :  { %745 = vmatpush.bf16.msrb.mxu0 %v1696_v52  ;;  %v1593_v52 = vld [vmem:[#allocation2 + $0x158] sm:$0xf0]  ;;  %v2129_v62 = vld [vmem:[#allocation2 + $0x2d4] sm:$0xf]  ;;  %v1585_v3 = vld [vmem:[#allocation2 + $0x148] sm:$0xf0] }
  0x44   :  { %800 = vmatpush.bf16.msra.mxu2 %v1516_v49  ;;  %v1793_v49 = vld [vmem:[#allocation2 + $0x2e8] sm:$0xf0]  ;;  %v1596_v59 = vor.u32 %v2081_v51, %v1593_v52  ;;  %v2111_v5 = vld [vmem:[#allocation2 + $0x244] sm:$0xf]  ;;  %v1788_v8 = vor.u32 %v2129_v62, %v1785_v0  ;;  %v2109_v16 = vld [vmem:[#allocation2 + $0x234] sm:$0xf] }
  0x45   :  { %787 = vmatpush.bf16.msrb.mxu3 %v1444_v56  ;;  %v1668_v56 = vor.u32 %v2099_v43, %v1665_v46  ;;  %v1796_v57 = vor.u32 %v2131_v47, %v1793_v49  ;;  %v1713_v6 = vld [vmem:[#allocation2 + $0x248] sm:$0xf0]  ;;  %v2095_v9 = vld [vmem:[#allocation2 + $0x1c4] sm:$0xf]  ;;  %v1705_v17 = vld [vmem:[#allocation2 + $0x238] sm:$0xf0] }
  0x46   :  { %759 = vmatpush.bf16.msrb.mxu1 %v1760_v61  ;;  %v1657_v61 = vld [vmem:[#allocation2 + $0x1d8] sm:$0xf0]  ;;  %v1649_v10 = vld [vmem:[#allocation2 + $0x1c8] sm:$0xf0]  ;;  %v1716_v14 = vor.u32 %v2111_v5, %v1713_v6  ;;  %v2125_v22 = vld [vmem:[#allocation2 + $0x2b4] sm:$0xf]  ;;  %v1708_v24 = vor.u32 %v2109_v16, %v1705_v17 }
  0x47   :  { %746 = vmatpush.bf16.msrb.mxu0 %v1688_v7  ;;  %v1660_v7 = vor.u32 %v2097_v58, %v1657_v61  ;;  %v1777_v13 = vld [vmem:[#allocation2 + $0x2c8] sm:$0xf0]  ;;  %v1641_v21 = vld [vmem:[#allocation2 + $0x1b8] sm:$0xf0]  ;;  %v2075_v25 = vld [vmem:[#allocation2 + $0x124] sm:$0xf] }
  0x48   :  { %801 = vmatpush.bf16.msra.mxu2 %v1508_v2  ;;  %v2079_v2 = vld [vmem:[#allocation2 + $0x144] sm:$0xf]  ;;  %v1569_v26 = vld [vmem:[#allocation2 + $0x128] sm:$0xf0]  ;;  %v1561_v39 = vld [vmem:[#allocation2 + $0x118] sm:$0xf0] }
  0x49   :  { %788 = vmatpush.bf16.msrb.mxu3 %v1436_v11  ;;  %v2127_v11 = vld [vmem:[#allocation2 + $0x2c4] sm:$0xf]  ;;  %v1588_v12 = vor.u32 %v2079_v2, %v1585_v3  ;;  %v1761_v35 = vld [vmem:[#allocation2 + $0x2a8] sm:$0xf0]  ;;  %v2105_v40 = vld [vmem:[#allocation2 + $0x214] sm:$0xf] }
  0x4a   :  { %760 = vmatpush.bf16.msrb.mxu1 %v1752_v15  ;;  %v2077_v15 = vld [vmem:[#allocation2 + $0x134] sm:$0xf]  ;;  %v1780_v18 = vor.u32 %v2127_v11, %v1777_v13  ;;  %v2091_v31 = vld [vmem:[#allocation2 + $0x1a4] sm:$0xf]  ;;  %v1625_v47 = vld [vmem:[#allocation2 + $0x198] sm:$0xf0] }
  0x4b   :  { %747 = vmatpush.bf16.msrb.mxu0 %v1680_v23  ;;  %v1769_v23 = vld [vmem:[#allocation2 + $0x2b8] sm:$0xf0]  ;;  %v2123_v34 = vld [vmem:[#allocation2 + $0x2a4] sm:$0xf]  ;;  %v2121_v49 = vld [vmem:[#allocation2 + $0x294] sm:$0xf] }
  0x4c   :  { %802 = vmatpush.bf16.msra.mxu2 %v1500_v19  ;;  %v2093_v19 = vld [vmem:[#allocation2 + $0x1b4] sm:$0xf]  ;;  %v1772_v30 = vor.u32 %v2125_v22, %v1769_v23  ;;  %v1764_v43 = vor.u32 %v2123_v34, %v1761_v35  ;;  %v2071_v52 = vld [vmem:[#allocation2 + $0x104] sm:$0xf]  ;;  %v1553_v53 = vld [vmem:[#allocation2 + $0x108] sm:$0xf0] }
  0x4d   :  { %789 = vmatpush.bf16.msrb.mxu3 %v1428_v27  ;;  %v2107_v27 = vld [vmem:[#allocation2 + $0x224] sm:$0xf]  ;;  %v1644_v29 = vor.u32 %v2093_v19, %v1641_v21  ;;  %v1617_v62 = vld [vmem:[#allocation2 + $0x188] sm:$0xf0]  ;;  %v2150_v11 = vld [vmem:[%s2638_s3 + $0x64] sm:$0xf0] }
  0x4e   :  { %761 = vmatpush.bf16.msrb.mxu1 %v1744_v33  ;;  %748 = vmatmul.bf16.vlgmr.msrb.gmra.mxu0 %v2386_v37  ;;  %v1633_v33 = vld [vmem:[#allocation2 + $0x1a8] sm:$0xf0]  ;;  %v2103_v55 = vld [vmem:[#allocation2 + $0x204] sm:$0xf]  ;;  %v2148_v16 = vld [vmem:[%s2638_s3 + $0x54] sm:$0xf0] }
  0x4f   :  { %810 = vmatpush.bf16.msra.mxu0 %v1612_v28  ;;  %v1697_v28 = vld [vmem:[#allocation2 + $0x228] sm:$0xf0]  ;;  %v2087_v61 = vld [vmem:[#allocation2 + $0x184] sm:$0xf]  ;;  %v2147_v17 = vld [vmem:[%s2638_s3 + $0x54] sm:$0xf] }
  0x50   :  { %803 = vmatpush.bf16.msra.mxu2 %v1492_v38  ;;  %790 = vmatmul.bf16.vlgmr.msrb.gmra.mxu3 %v2354_v60  ;;  %v1652_v60 = vor.u32 %v2095_v9, %v1649_v10  ;;  %v1700_v36 = vor.u32 %v2107_v27, %v1697_v28  ;;  %v2073_v38 = vld [vmem:[#allocation2 + $0x114] sm:$0xf]  ;;  %v1745_v2 = vld [vmem:[#allocation2 + $0x288] sm:$0xf0]  ;;  %v2135_v3 = vld [vmem:[#allocation2 + $0x304] sm:$0xf]  ;;  %v1620_v6 = vor.u32 %v2087_v61, %v1617_v62 }
  0x51   :  { %838 = vmatpush.bf16.msra.mxu3 %v1740_v32  ;;  %762 = vmatmul.bf16.vlgmr.msrb.gmra.mxu1 %v2388_v44  ;;  %v1572_v32 = vor.u32 %v2075_v25, %v1569_v26  ;;  %v1564_v46 = vor.u32 %v2073_v38, %v1561_v39  ;;  %v1809_v5 = vld [vmem:[#allocation2 + $0x308] sm:$0xf0]  ;;  %v1873_v9 = vld [vmem:[%s2638_s3 + $0x70] sm:$0xf]  ;;  %v2152_v10 = vld [vmem:[%s2638_s3 + $0x74] sm:$0xf0] }
  0x52   :  { %824 = vmatpush.bf16.msra.mxu1 %v1676_v41  ;;  %v1689_v41 = vld [vmem:[#allocation2 + $0x218] sm:$0xf0]  ;;  %v2146_v21 = vld [vmem:[%s2638_s3 + $0x44] sm:$0xf0]  ;;  %v2145_v22 = vld [vmem:[%s2638_s3 + $0x44] sm:$0xf] }
  0x53   :  { %811 = vmatpush.bf16.msra.mxu0 %v1604_v45  ;;  %804 = vmatmul.bf16.vlgmr.msra.gmra.mxu2 %v2358_v4  ;;  %v1577_v4 = vld [vmem:[#allocation2 + $0x138] sm:$0xf0]  ;;  %v2089_v45 = vld [vmem:[#allocation2 + $0x194] sm:$0xf]  ;;  %v1692_v51 = vor.u32 %v2105_v40, %v1689_v41  ;;  %v1841_v26 = vld [vmem:[%s2638_s3 + $0x30] sm:$0xf] }
  0x54   :  { %852 = vmatpush.bf16.msrb.mxu2 %v1804_v42  ;;  %v1580_v20 = vor.u32 %v2077_v15, %v1577_v4  ;;  %v1636_v42 = vor.u32 %v2091_v31, %v1633_v33  ;;  %v1857_v4 = vld [vmem:[%s2638_s3 + $0x50] sm:$0xf]  ;;  %v2144_v27 = vld [vmem:[%s2638_s3 + $0x34] sm:$0xf0]  ;;  %v2143_v28 = vld [vmem:[%s2638_s3 + $0x34] sm:$0xf] }
  0x55   :  { %839 = vmatpush.bf16.msra.mxu3 %v1732_v50  ;;  %v1753_v50 = vld [vmem:[#allocation2 + $0x298] sm:$0xf0]  ;;  %v2142_v33 = vld [vmem:[%s2638_s3 + $0x24] sm:$0xf0]  ;;  %v2141_v34 = vld [vmem:[%s2638_s3 + $0x24] sm:$0xf] }
  0x56   :  { %825 = vmatpush.bf16.msra.mxu1 %v1668_v56  ;;  %v1681_v56 = vld [vmem:[#allocation2 + $0x208] sm:$0xf0]  ;;  %v1756_v58 = vor.u32 %v2121_v49, %v1753_v50  ;;  %v1825_v39 = vld [vmem:[%s2638_s3 + $0x10] sm:$0xf]  ;;  %v2140_v40 = vld [vmem:[%s2638_s3 + $0x14] sm:$0xf0] }
  0x57   :  { %812 = vmatpush.bf16.msra.mxu0 %v1596_v59  ;;  %v1556_v59 = vor.u32 %v2071_v52, %v1553_v53  ;;  %v1684_v0 = vor.u32 %v2103_v55, %v1681_v56  ;;  %v2139_v41 = vld [vmem:[%s2638_s3 + $0x14] sm:$0xf]  ;;  %v1817_v49 = vld [vmem:[%s2638_s3] sm:$0xf]  ;;  %v2138_v50 = vld [vmem:[%s2638_s3 + $0x4] sm:$0xf0] }
  0x58   :  { %853 = vmatpush.bf16.msrb.mxu2 %v1796_v57  ;;  %v1628_v57 = vor.u32 %v2089_v45, %v1625_v47  ;;  %v1818_v53 = vor.u32 %v2138_v50, %v1817_v49  ;;  %v1819_v55 = vld [vmem:[%s2638_s3 + $0x8] sm:$0xf0]  ;;  %v2159_v49 = vld [vmem:[%s2638_s3 + $0xb4] sm:$0xf] }
  0x59   :  { %840 = vmatpush.bf16.msra.mxu3 %v1724_v1  ;;  %v2119_v1 = vld [vmem:[#allocation2 + $0x284] sm:$0xf] }
  0x5a   :  { %826 = vmatpush.bf16.msra.mxu1 %v1660_v7  ;;  %v1748_v7 = vor.u32 %v2119_v1, %v1745_v2 }
  0x5b   :  { %813 = vmatpush.bf16.msra.mxu0 %v1588_v12  ;;  %v2149_v12 = vld [vmem:[%s2638_s3 + $0x64] sm:$0xf] }
  0x5c   :  { %854 = vmatpush.bf16.msrb.mxu2 %v1788_v8  ;;  %v1812_v8 = vor.u32 %v2135_v3, %v1809_v5 }
  0x5d   :  { %841 = vmatpush.bf16.msra.mxu3 %v1716_v14  ;;  %v1867_v14 = vld [vmem:[%s2638_s3 + $0x68] sm:$0xf0] }
  0x5e   :  { %827 = vmatpush.bf16.msra.mxu1 %v1652_v60  ;;  %v1870_v15 = vor.u32 %v2149_v12, %v1867_v14  ;;  %v1859_v60 = vld [vmem:[%s2638_s3 + $0x58] sm:$0xf0] }
  0x5f   :  { %814 = vmatpush.bf16.msra.mxu0 %v1580_v20  ;;  %v1862_v19 = vor.u32 %v2147_v17, %v1859_v60  ;;  %v1849_v20 = vld [vmem:[%s2638_s3 + $0x40] sm:$0xf]  ;;  %v2166_v60 = vld [vmem:[%s2638_s3 + $0xe4] sm:$0xf0] }
  0x60   :  { %855 = vmatpush.bf16.msrb.mxu2 %v1780_v18  ;;  %v1858_v18 = vor.u32 %v2148_v16, %v1857_v4  ;;  %v1850_v23 = vor.u32 %v2146_v21, %v1849_v20  ;;  %v1929_v17 = vld [vmem:[%s2638_s3 + $0xe0] sm:$0xf]  ;;  %v1931_v21 = vld [vmem:[%s2638_s3 + $0xe8] sm:$0xf0] }
  0x61   :  { %842 = vmatpush.bf16.msra.mxu3 %v1708_v24  ;;  %v1851_v24 = vld [vmem:[%s2638_s3 + $0x48] sm:$0xf0]  ;;  %v1930_v20 = vor.u32 %v2166_v60, %v1929_v17 }
  0x62   :  { %828 = vmatpush.bf16.msra.mxu1 %v1644_v29  ;;  %v1854_v25 = vor.u32 %v2145_v22, %v1851_v24  ;;  %v1842_v29 = vor.u32 %v2144_v27, %v1841_v26  ;;  %v1921_v27 = vld [vmem:[%s2638_s3 + $0xd0] sm:$0xf] }
  0x63   :  { %815 = vmatpush.bf16.msra.mxu0 %v1572_v32  ;;  %v1833_v32 = vld [vmem:[%s2638_s3 + $0x20] sm:$0xf] }
  0x64   :  { %856 = vmatpush.bf16.msrb.mxu2 %v1772_v30  ;;  %v1843_v30 = vld [vmem:[%s2638_s3 + $0x38] sm:$0xf0]  ;;  %v1834_v35 = vor.u32 %v2142_v33, %v1833_v32 }
  0x65   :  { %843 = vmatpush.bf16.msra.mxu3 %v1700_v36  ;;  %v1846_v31 = vor.u32 %v2143_v28, %v1843_v30  ;;  %v1835_v36 = vld [vmem:[%s2638_s3 + $0x28] sm:$0xf0]  ;;  %v2164_v28 = vld [vmem:[%s2638_s3 + $0xd4] sm:$0xf0]  ;;  %v1923_v32 = vld [vmem:[%s2638_s3 + $0xd8] sm:$0xf0] }
  0x66   :  { %829 = vmatpush.bf16.msra.mxu1 %v1636_v42  ;;  %v1838_v38 = vor.u32 %v2141_v34, %v1835_v36  ;;  %v1826_v42 = vor.u32 %v2140_v40, %v1825_v39  ;;  %v1913_v36 = vld [vmem:[%s2638_s3 + $0xc0] sm:$0xf]  ;;  %v2161_v39 = vld [vmem:[%s2638_s3 + $0xc4] sm:$0xf] }
  0x67   :  { %816 = vmatpush.bf16.msra.mxu0 %v1564_v46  ;;  %v2487_v46 = vld [vmem:[%s2637_s2] sm:$0x3] }
  0x68   :  { %857 = vmatpush.bf16.msrb.mxu2 %v1764_v43  ;;  %v1827_v43 = vld [vmem:[%s2638_s3 + $0x18] sm:$0xf0] }
  0x69   :  { %844 = vmatpush.bf16.msra.mxu3 %v1692_v51  ;;  %v1830_v45 = vor.u32 %v2139_v41, %v1827_v43  ;;  %v2137_v51 = vld [vmem:[%s2638_s3 + $0x4] sm:$0xf] }
  0x6a   :  { %830 = vmatpush.bf16.msra.mxu1 %v1628_v57  ;;  %v1822_v57 = vor.u32 %v2137_v51, %v1819_v55  ;;  %v1897_v55 = vld [vmem:[%s2638_s3 + $0xa0] sm:$0xf] }
  0x6b   :  { %817 = vmatpush.bf16.msra.mxu0 %v1556_v59 }
  0x6c   :  { %858 = vmatpush.bf16.msrb.mxu2 %v1756_v58  ;;  %v186_v58 = vperm.slane %v2487_v46, 0 }
  0x6d   :  { %845 = vmatpush.bf16.msra.mxu3 %v1684_v0 }
  0x6e   :  { %831 = vmatpush.bf16.msra.mxu1 %v1620_v6  ;;  %818 = vmatmul.bf16.vlgmr.msra.gmra.mxu0 %v2346_v54  ;;  %v2151_v54 = vld [vmem:[%s2638_s3 + $0x74] sm:$0xf] }
  0x70   :  { %846 = vmatmul.bf16.vlgmr.msra.gmra.mxu3 %v2386_v37  ;;  %859 = vmatpush.bf16.msrb.mxu2 %v1748_v7  ;;  %v1874_v37 = vor.u32 %v2152_v10, %v1873_v9 }
  0x71   :  { %832 = vmatmul.bf16.vlgmr.msra.gmra.mxu1 %v2356_v63  ;;  %v1875_v63 = vld [vmem:[%s2638_s3 + $0x78] sm:$0xf0] }
  0x72   :  { %1084 = vmatpush.bf16.msrb.mxu1 %v1874_v37 }
  0x73   :  { %860 = vmatmul.bf16.vlgmr.msrb.gmra.mxu2 %v2388_v44  ;;  %v1878_v44 = vor.u32 %v2151_v54, %v1875_v63 }
  0x74   :  { %873 = vmatpush.bf16.msra.mxu2 %v1812_v8 }
  0x75   :  { %1112 = vmatpush.bf16.msrb.mxu0 %v1878_v44  ;;  %v1937_v44 = vld [vmem:[%s2638_s3 + $0xf0] sm:$0xf] }
  0x79   :  { %1113 = vmatpush.bf16.msrb.mxu0 %v1870_v15 }
  0x7d   :  { %1114 = vmatpush.bf16.msrb.mxu0 %v1862_v19 }
  0x81   :  { %1115 = vmatpush.bf16.msrb.mxu0 %v1854_v25 }
  0x83   :  { %1814 = vmatmul.msk.bf16.vlgmr.msra.gmra.mxu2 %vm680_vm0, %v2370_v48  ;;  %v1865_v48 = vld [vmem:[%s2638_s3 + $0x60] sm:$0xf] }
  0x84   :  { %v1866_v13 = vor.u32 %v2150_v11, %v1865_v48  ;;  %v2168_v48 = vld [vmem:[%s2638_s3 + $0xf4] sm:$0xf0]  ;;  %v2167_v11 = vld [vmem:[%s2638_s3 + $0xf4] sm:$0xf] }
  0x85   :  { %1116 = vmatpush.bf16.msrb.mxu0 %v1846_v31  ;;  %v1938_v12 = vor.u32 %v2168_v48, %v1937_v44  ;;  %v1922_v31 = vor.u32 %v2164_v28, %v1921_v27 }
  0x86   :  { %1085 = vmatpush.bf16.msrb.mxu1 %v1866_v13  ;;  %v1939_v13 = vld [vmem:[%s2638_s3 + $0xf8] sm:$0xf0] }
  0x87   :  { %v1942_v14 = vor.u32 %v2167_v11, %v1939_v13  ;;  %1098 = vmatpush.bf16.msrb.mxu3 %v1938_v12  ;;  %v187_v12 = vperm.slane %v2487_v46, 1 }
  0x89   :  { %1117 = vmatpush.bf16.msrb.mxu0 %v1838_v38  ;;  %1126 = vmatpush.bf16.msrb.mxu2 %v1942_v14  ;;  %v2162_v38 = vld [vmem:[%s2638_s3 + $0xc4] sm:$0xf0] }
  0x8a   :  { %1086 = vmatpush.bf16.msrb.mxu1 %v1858_v18  ;;  %v2165_v18 = vld [vmem:[%s2638_s3 + $0xe4] sm:$0xf]  ;;  %v1914_v41 = vor.u32 %v2162_v38, %v1913_v36  ;;  %v2184_v36 = vld [vmem:[#allocation4 + $0x78] sm:$0xff] }
  0x8b   :  { %1099 = vmatpush.bf16.msrb.mxu3 %v1930_v20  ;;  %v2175_v38 = vld [vmem:[#allocation4 + $0x30] sm:$0xff] }
  0x8d   :  { %1118 = vmatpush.bf16.msrb.mxu0 %v1830_v45  ;;  %v1905_v45 = vld [vmem:[%s2638_s3 + $0xb0] sm:$0xf] }
  0x8e   :  { %1087 = vmatpush.bf16.msrb.mxu1 %v1850_v23  ;;  %v1934_v23 = vor.u32 %v2165_v18, %v1931_v21 }
  0x8f   :  { %1100 = vmatpush.bf16.msrb.mxu3 %v1922_v31 }
  0x90   :  { %1127 = vmatpush.bf16.msrb.mxu2 %v1934_v23 }
  0x91   :  { %1119 = vmatpush.bf16.msrb.mxu0 %v1822_v57  ;;  %v2157_v57 = vld [vmem:[%s2638_s3 + $0xa4] sm:$0xf] }
  0x92   :  { %1088 = vmatpush.bf16.msrb.mxu1 %v1842_v29  ;;  %v2163_v29 = vld [vmem:[%s2638_s3 + $0xd4] sm:$0xf] }
  0x93   :  { %v1926_v33 = vor.u32 %v2163_v29, %v1923_v32  ;;  %1101 = vmatpush.bf16.msrb.mxu3 %v1914_v41  ;;  %v2182_v41 = vld [vmem:[#allocation4 + $0x68] sm:$0xff] }
  0x95   :  { %1128 = vmatpush.bf16.msrb.mxu2 %v1926_v33 }
  0x96   :  { %1089 = vmatpush.bf16.msrb.mxu1 %v1834_v35 }
  0x9a   :  { %1090 = vmatpush.bf16.msrb.mxu1 %v1826_v42  ;;  %v1915_v42 = vld [vmem:[%s2638_s3 + $0xc8] sm:$0xf0] }
  0x9b   :  { %v1918_v43 = vor.u32 %v2161_v39, %v1915_v42  ;;  %v2183_v39 = vld [vmem:[#allocation4 + $0x70] sm:$0xff]  ;;  %v2173_v42 = vld [vmem:[#allocation4 + $0x20] sm:$0xff] }
  0x9d   :  { %1129 = vmatpush.bf16.msrb.mxu2 %v1918_v43  ;;  %v2181_v43 = vld [vmem:[#allocation4 + $0x60] sm:$0xff] }
  0x9e   :  { %1091 = vmatpush.bf16.msrb.mxu1 %v1818_v53 }
  0xab   :  { %v693_v47 = vpop.f32.mrf.mxu0 }
  0xac   :  { %v694_v59 = vadd.f32 %v693_v47, %v186_v58  ;;  %v2160_v47 = vld [vmem:[%s2638_s3 + $0xb4] sm:$0xf0] }
  0xad   :  { %v1906_v51 = vor.u32 %v2160_v47, %v1905_v45  ;;  %v2172_v45 = vld [vmem:[#allocation4 + $0x18] sm:$0xff] }
  0xae   :  { %v707_v56 = vpop.f32.mrf.mxu1  ;;  %v2180_v47 = vld [vmem:[#allocation4 + $0x58] sm:$0xff] }
  0xaf   :  { %v708_v62 = vadd.f32 %v707_v56, %v694_v59  ;;  %1102 = vmatpush.bf16.msrb.mxu3 %v1906_v51  ;;  %v2158_v56 = vld [vmem:[%s2638_s3 + $0xa4] sm:$0xf0]  ;;  %v1899_v59 = vld [vmem:[%s2638_s3 + $0xa8] sm:$0xf0]  ;;  %v2170_v51 = vld [vmem:[#allocation4 + $0x8] sm:$0xff] }
  0xb2   :  { %v721_v52 = vpop.f32.mrf.mxu2 }
  0xb3   :  { %v695_v61 = vpop.f32.mrf.mxu0  ;;  %v735_v1 = vpop.f32.mrf.mxu3  ;;  %v722_v5 = vadd.f32 %v721_v52, %v708_v62  ;;  %v1907_v52 = vld [vmem:[%s2638_s3 + $0xb8] sm:$0xf0] }
  0xb4   :  { %v696_v3 = vadd.f32 %v695_v61, %v186_v58  ;;  %v1910_v53 = vor.u32 %v2159_v49, %v1907_v52  ;;  %v1898_v58 = vor.u32 %v2158_v56, %v1897_v55  ;;  %v1902_v61 = vor.u32 %v2157_v57, %v1899_v59  ;;  %v2171_v49 = vld [vmem:[#allocation4 + $0x10] sm:$0xff]  ;;  %v2178_v52 = vld [vmem:[#allocation4 + $0x48] sm:$0xff]  ;;  %v2177_v55 = vld [vmem:[#allocation4 + $0x40] sm:$0xff] }
  0xb5   :  { %v736_v8 = vadd.f32 %v735_v1, %v722_v5  ;;  %v2156_v1 = vld [vmem:[%s2638_s3 + $0x94] sm:$0xf0]  ;;  %v1891_v5 = vld [vmem:[%s2638_s3 + $0x98] sm:$0xf0]  ;;  %v2191_v57 = vld [vmem:[%s2642_s7 + $0x30] sm:$0xff] }
  0xb6   :  { %v709_v2 = vpop.f32.mrf.mxu1  ;;  %1130 = vmatpush.bf16.msrb.mxu2 %v1910_v53  ;;  %1103 = vmatpush.bf16.msrb.mxu3 %v1898_v58  ;;  %v2169_v53 = vld [vmem:[#allocation4] sm:$0xff]  ;;  %v2192_v56 = vld [vmem:[%s2642_s7 + $0x38] sm:$0xff]  ;;  %v2190_v58 = vld [vmem:[%s2642_s7 + $0x28] sm:$0xff] }
  0xb7   :  { %v710_v6 = vadd.f32 %v709_v2, %v696_v3  ;;  %v2155_v2 = vld [vmem:[%s2638_s3 + $0x94] sm:$0xf]  ;;  %1377 = vmatpush.bf16.msra.mxu0 %v2192_v56 }
  0xba   :  { %v723_v0 = vpop.f32.mrf.mxu2  ;;  %1131 = vmatpush.bf16.msrb.mxu2 %v1902_v61 }
  0xbb   :  { %v724_v54 = vadd.f32 %v723_v0, %v710_v6  ;;  %v737_v63 = vpop.f32.mrf.mxu3  ;;  %v1889_v0 = vld [vmem:[%s2638_s3 + $0x90] sm:$0xf]  ;;  %v1894_v6 = vor.u32 %v2155_v2, %v1891_v5  ;;  %1378 = vmatpush.bf16.msra.mxu0 %v2191_v57 }
  0xbc   :  { %v1890_v3 = vor.u32 %v2156_v1, %v1889_v0 }
  0xbd   :  { %v738_v15 = vadd.f32 %v737_v63, %v724_v54 }
  0xbe   :  { %1104 = vmatpush.bf16.msrb.mxu3 %v1890_v3  ;;  %1132 = vmatpush.bf16.msrb.mxu2 %v1894_v6 }
  0xbf   :  { %1379 = vmatpush.bf16.msra.mxu0 %v2190_v58 }
  0xc2   :  { %v777_v9 = vpop.f32.mrf.mxu2 }
  0xca   :  { %v779_v25 = vpop.f32.mrf.mxu2 }
  0xcb   :  { %v749_v7 = vpop.f32.mrf.mxu0 }
  0xcc   :  { %v750_v37 = vadd.f32 %v749_v7, %v736_v8  ;;  %v1881_v8 = vld [vmem:[%s2638_s3 + $0x80] sm:$0xf] }
  0xce   :  { %v763_v10 = vpop.f32.mrf.mxu1 }
  0xcf   :  { %v764_v4 = vadd.f32 %v763_v10, %v750_v37  ;;  %v2153_v10 = vld [vmem:[%s2638_s3 + $0x84] sm:$0xf]  ;;  %v1883_v37 = vld [vmem:[%s2638_s3 + $0x88] sm:$0xf0] }
  0xd0   :  { %v1886_v63 = vor.u32 %v2153_v10, %v1883_v37 }
  0xd1   :  { %v778_v24 = vadd.f32 %v777_v9, %v764_v4  ;;  %v2154_v9 = vld [vmem:[%s2638_s3 + $0x84] sm:$0xf0] }
  0xd2   :  { %v1882_v54 = vor.u32 %v2154_v9, %v1881_v8  ;;  %1133 = vmatpush.bf16.msrb.mxu2 %v1886_v63 }
  0xd3   :  { %v751_v16 = vpop.f32.mrf.mxu0  ;;  %v880_v34 = vmax.f32 %v778_v24, 0.0  ;;  %v791_v62 = vpop.f32.mrf.mxu3 }
  0xd4   :  { %v752_v19 = vadd.f32 %v751_v16, %v738_v15  ;;  %1105 = vmatpush.bf16.msrb.mxu3 %v1882_v54  ;;  %v792_v14 = vadd.f32 %v791_v62, %v187_v12  ;;  %v918_v62 = vld [vmem:[%s2639_s4] sm:$0x3] }
  0xd5   :  { %v920_v2 = vperm.slane %v918_v62, 0  ;;  %v921_v3 = vperm.slane %v918_v62, 1 }
  0xd6   :  { %v765_v22 = vpop.f32.mrf.mxu1  ;;  %v805_v50 = vpop.f32.mrf.mxu2 }
  0xd7   :  { %v766_v26 = vadd.f32 %v765_v22, %v752_v19  ;;  %v806_v17 = vadd.f32 %v805_v50, %v792_v14  ;;  %v2179_v50 = vld [vmem:[#allocation4 + $0x50] sm:$0xff] }
  0xd8   :  { %1292 = vmatpush.bf16.msra.mxu3 %v2184_v36 }
  0xd9   :  { %v780_v30 = vadd.f32 %v779_v25, %v766_v26 }
  0xdb   :  { %v882_v35 = vmax.f32 %v780_v30, 0.0  ;;  %v793_v44 = vpop.f32.mrf.mxu3 }
  0xdc   :  { %v794_v4 = vadd.f32 %v793_v44, %v187_v12  ;;  %1293 = vmatpush.bf16.msra.mxu3 %v2183_v39 }
  0xdd   :  { %v884_v40 = vpack.c.bf16 %v882_v35, %v880_v34  ;;  %v2176_v35 = vld [vmem:[#allocation4 + $0x38] sm:$0xff] }
  0xde   :  { %v807_v7 = vpop.f32.mrf.mxu2  ;;  %1278 = vmatpush.bf16.msra.mxu1 %v2176_v35 }
  0xdf   :  { %1092 = vmatmul.bf16.vlgmr.msrb.gmra.mxu1 %v884_v40  ;;  %1120 = vmatmul.bf16.vlgmr.msrb.gmra.mxu0 %v884_v40  ;;  %v808_v18 = vadd.f32 %v807_v7, %v794_v4  ;;  %v2174_v40 = vld [vmem:[#allocation4 + $0x28] sm:$0xff] }
  0xe0   :  { %1294 = vmatpush.bf16.msra.mxu3 %v2182_v41 }
  0xe2   :  { %1279 = vmatpush.bf16.msra.mxu1 %v2175_v38 }
  0xe4   :  { %1295 = vmatpush.bf16.msra.mxu3 %v2181_v43 }
  0xe6   :  { %1280 = vmatpush.bf16.msra.mxu1 %v2174_v40 }
  0xe8   :  { %1296 = vmatpush.bf16.msra.mxu3 %v2180_v47 }
  0xea   :  { %1281 = vmatpush.bf16.msra.mxu1 %v2173_v42 }
  0xeb   :  { %v819_v48 = vpop.f32.mrf.mxu0 }
  0xec   :  { %v820_v19 = vadd.f32 %v819_v48, %v806_v17  ;;  %1297 = vmatpush.bf16.msra.mxu3 %v2179_v50  ;;  %v2189_v17 = vld [vmem:[%s2642_s7 + $0x20] sm:$0xff] }
  0xed   :  { %1380 = vmatpush.bf16.msra.mxu0 %v2189_v17 }
  0xee   :  { %v833_v13 = vpop.f32.mrf.mxu1  ;;  %1282 = vmatpush.bf16.msra.mxu1 %v2172_v45 }
  0xef   :  { %v834_v22 = vadd.f32 %v833_v13, %v820_v19  ;;  %v2186_v19 = vld [vmem:[%s2642_s7 + $0x8] sm:$0xff] }
  0xf0   :  { %1298 = vmatpush.bf16.msra.mxu3 %v2178_v52 }
  0xf2   :  { %1283 = vmatpush.bf16.msra.mxu1 %v2171_v49 }
  0xf3   :  { %v847_v15 = vpop.f32.mrf.mxu3  ;;  %v821_v60 = vpop.f32.mrf.mxu0 }
  0xf4   :  { %v822_v20 = vadd.f32 %v821_v60, %v808_v18  ;;  %v848_v25 = vadd.f32 %v847_v15, %v834_v22  ;;  %1299 = vmatpush.bf16.msra.mxu3 %v2177_v55  ;;  %v2188_v60 = vld [vmem:[%s2642_s7 + $0x18] sm:$0xff]  ;;  %v2187_v18 = vld [vmem:[%s2642_s7 + $0x10] sm:$0xff] }
  0xf5   :  { %1381 = vmatpush.bf16.msra.mxu0 %v2188_v60 }
  0xf6   :  { %v861_v11 = vpop.f32.mrf.mxu2  ;;  %v835_v21 = vpop.f32.mrf.mxu1  ;;  %1284 = vmatpush.bf16.msra.mxu1 %v2170_v51 }
  0xf7   :  { %v836_v26 = vadd.f32 %v835_v21, %v822_v20  ;;  %v862_v28 = vadd.f32 %v861_v11, %v848_v25  ;;  %v2185_v20 = vld [vmem:[%s2642_s7] sm:$0xff] }
  0xf9   :  { %1382 = vmatpush.bf16.msra.mxu0 %v2187_v18 }
  0xfa   :  { %1285 = vmatpush.bf16.msra.mxu1 %v2169_v53 }
  0xfb   :  { %v849_v23 = vpop.f32.mrf.mxu3 }
  0xfc   :  { %v850_v27 = vadd.f32 %v849_v23, %v836_v26  ;;  %v2204_v23 = vld [vmem:[%s2641_s6] ss:$0 sm:$0xff] }
  0xfd   :  { %1383 = vmatpush.bf16.msra.mxu0 %v2186_v19 }
  0xfe   :  { %v863_v16 = vpop.f32.mrf.mxu2 }
  0xff   :  { %v864_v29 = vadd.f32 %v863_v16, %v850_v27 }
 0x101   :  { %1384 = vmatpush.bf16.msra.mxu0 %v2185_v20 }
 0x106   :  { %v875_v24 = vpop.f32.mrf.mxu2 }
 0x107   :  { %v876_v46 = vadd.f32 %v875_v24, %v862_v28 }
 0x109   :  { %v881_v32 = vmax.f32 %v876_v46, 0.0 }
 0x10e   :  { %v877_v30 = vpop.f32.mrf.mxu2 }
 0x10f   :  { %v878_v31 = vadd.f32 %v877_v30, %v864_v29 }
 0x111   :  { %v883_v33 = vmax.f32 %v878_v31, 0.0 }
 0x113   :  { %v885_v34 = vpack.c.bf16 %v883_v33, %v881_v32  ;;  %v2205_v32 = vld [vmem:[%s2643_s8] ss:$0 sm:$0xff] }
 0x115   :  { %1106 = vmatmul.bf16.vlgmr.msrb.gmra.mxu3 %v885_v34  ;;  %1134 = vmatmul.bf16.vlgmr.msrb.gmra.mxu2 %v885_v34 }
 0x15c   :  { %v1093_v59 = vpop.f32.mrf.mxu1  ;;  %v1121_v61 = vpop.f32.mrf.mxu0 }
 0x15d   :  { %v1094_v7 = vadd.f32 %v1093_v59, %v920_v2  ;;  %v1122_v8 = vadd.f32 %v1121_v61, %v921_v3 }
 0x164   :  { %v1095_v5 = vpop.f32.mrf.mxu1  ;;  %v1123_v6 = vpop.f32.mrf.mxu0 }
 0x165   :  { %v1096_v9 = vadd.f32 %v1095_v5, %v920_v2  ;;  %v1124_v10 = vadd.f32 %v1123_v6, %v921_v3 }
 0x198   :  { %v1107_v0 = vpop.f32.mrf.mxu3  ;;  %v1135_v1 = vpop.f32.mrf.mxu2 }
 0x199   :  { %v1108_v54 = vadd.f32 %v1107_v0, %v1094_v7  ;;  %v1136_v37 = vadd.f32 %v1135_v1, %v1122_v8 }
 0x19b   :  { %v1140_v12 = vmax.f32 %v1108_v54, 0.0  ;;  %v1141_v13 = vmax.f32 %v1136_v37, 0.0 }
 0x1a0   :  { %v1109_v63 = vpop.f32.mrf.mxu3  ;;  %v1137_v44 = vpop.f32.mrf.mxu2 }
 0x1a1   :  { %v1110_v48 = vadd.f32 %v1109_v63, %v1096_v9  ;;  %v1138_v11 = vadd.f32 %v1137_v44, %v1124_v10 }
 0x1a3   :  { %v1142_v14 = vmax.f32 %v1110_v48, 0.0  ;;  %v1143_v15 = vmax.f32 %v1138_v11, 0.0 }
 0x1a5   :  { %v1144_v4 = vpack.c.bf16 %v1142_v14, %v1140_v12  ;;  %v1145_v16 = vpack.c.bf16 %v1143_v15, %v1141_v13 }
 0x1a7   :  { %1286 = vmatmul.bf16.vlgmr.msra.gmra.mxu1 %v1144_v4  ;;  %1300 = vmatmul.bf16.vlgmr.msra.gmra.mxu3 %v1145_v16 }
 0x224   :  { %v1287_v21 = vpop.f32.mrf.mxu1 }
 0x225   :  { %v1288_v25 = vadd.f32 %v2204_v23, %v1287_v21 }
 0x22a   :  { %v1301_v22 = vpop.f32.mrf.mxu3 }
 0x22b   :  { %v1302_v26 = vadd.f32 %v1301_v22, %v1288_v25 }
 0x22c   :  { %v1289_v24 = vpop.f32.mrf.mxu1 }
 0x22d   :  { %v1290_v27 = vadd.f32 %v2204_v23, %v1289_v24  ;;  %v1306_v46 = vmax.f32 %v1302_v26, 0.0 }
 0x232   :  { %v1303_v28 = vpop.f32.mrf.mxu3 }
 0x233   :  { %v1304_v29 = vadd.f32 %v1303_v28, %v1290_v27 }
 0x235   :  { %v1307_v30 = vmax.f32 %v1304_v29, 0.0 }
 0x237   :  { %v1308_v31 = vpack.c.bf16 %v1307_v30, %v1306_v46 }
 0x239   :  { %1385 = vmatmul.bf16.vlgmr.msra.gmra.mxu0 %v1308_v31 }
 0x2b6   :  { %v1386_v33 = vpop.f32.mrf.mxu0 }
 0x2b7   :  { %v1387_v34 = vadd.f32 %v2205_v32, %v1386_v33 }
 0x2b9   :  { %1391 = vmax.xlane.f32.xlu0 %v1387_v34 }
 0x2be   :  { %v1388_v35 = vpop.f32.mrf.mxu0 }
 0x2bf   :  { %v1389_v36 = vadd.f32 %v2205_v32, %v1388_v35 }
 0x2c1   :  { %1393 = vmax.xlane.f32.xlu0 %v1389_v36 }
 0x32c   :  { %v1392_v38 = vpop.xlane.xlu0 %1391 }
 0x32d   :  { %v1395_v39 = vsub.f32 %v1387_v34, %v1392_v38 }
 0x32f   :  { %v1397_v40 = vmul.f32 1.442695, %v1395_v39 }
 0x331   :  { %2206 = vpow2.f32 %v1397_v40 }
 0x334   :  { %v1394_v41 = vpop.xlane.xlu0 %1393 }
 0x335   :  { %v1396_v42 = vsub.f32 %v1389_v36, %v1394_v41 }
 0x337   :  { %v2207_v43 = vpop.eup %2206  ;;  %v1399_v45 = vmul.f32 1.442695, %v1396_v42 }
 0x338   :  { %1401 = vadd.xlane.f32.xlu1 %v2207_v43 }
 0x339   :  { %2208 = vpow2.f32 %v1399_v45 }
 0x33f   :  { %v2209_v47 = vpop.eup %2208 }
 0x340   :  { %1403 = vadd.xlane.f32.xlu1 %v2209_v47 }
 0x3ab   :  { %v1402_v49 = vpop.xlane.xlu1 %1401 }
 0x3ac   :  { %2210 = vlog2.f32 %v1402_v49 }
 0x3b2   :  { %v2211_v51 = vpop.eup %2210 }
 0x3b3   :  { %v1404_v50 = vpop.xlane.xlu1 %1403  ;;  %v1406_v52 = vmul.f32 0.6931472, %v2211_v51 }
 0x3b4   :  { %2212 = vlog2.f32 %v1404_v50 }
 0x3b5   :  { %v1409_v56 = vsub.f32 %v1395_v39, %v1406_v52 }
 0x3ba   :  { %v2213_v53 = vpop.eup %2212 }
 0x3bb   :  { %v1408_v55 = vmul.f32 0.6931472, %v2213_v53 }
 0x3bd   :  { %v1410_v57 = vsub.f32 %v1396_v42, %v1408_v55 }
 0x3bf   :  { %v2196_v58 = vpack.c.bf16 %v1410_v57, %v1409_v56 }
 0x3c1   :  { %2197 = vst [vmem:[%s2644_s9] sm:$0xff] %v2196_v58  }
 0x3c2   :  { %1419 = vsyncpa [#allocation3], 1 }
 0x3c3   :  { %1420 = vsyncpa [#allocation5], 1 }

</bundles_post_ra>
